<compile_context>
chip_gen: v5e
topology: v5e:2x2
jax: 0.10.0
libtpu: 0.0.40
codegen_flags: <defaults>
</compile_context>

<pallas_src>
import functools

import jax
import jax.numpy as jnp
from jax.experimental import pallas as pl
from jax.experimental.pallas import tpu as pltpu


def _round_up(x, m):
    return ((x + m - 1) // m) * m


def _patch_embed_kernel(x_ref, w_ref, b_ref, o_ref):
    # x_ref: (TM, K) bf16 patches, w_ref: (K, E_pad) bf16, b_ref: (1, E_pad) f32
    # o_ref: (TM, E_pad) output dtype
    acc = jnp.dot(x_ref[...], w_ref[...], preferred_element_type=jnp.float32)
    o_ref[...] = (acc + b_ref[...]).astype(o_ref.dtype)


def patch_embed(x, weight, bias, patch_size, *, block_m=512,
                compute_dtype=jnp.bfloat16):
    """PatchEmbed forward.

    x:      (B, C, H, W)    -- NCHW, same as PyTorch
    weight: (E, C, ph, pw)  -- nn.Conv2d weight layout
    bias:   (E,)            -- nn.Conv2d bias
    returns (B, num_patches, E), dtype of x (norm_layer=None => Identity)
    """
    B, C, H, W = x.shape
    ph, pw = patch_size
    E = weight.shape[0]
    assert H % ph == 0 and W % pw == 0, "image size must be divisible by patch size"
    gh, gw = H // ph, W // pw
    num_patches = gh * gw
    out_dtype = x.dtype

    # --- patch extraction in Conv2d unfold order (C, ph, pw) ---
    # (B, C, H, W) -> (B, C, gh, ph, gw, pw) -> (B, gh, gw, C, ph, pw) -> (B*N, K)
    patches = x.reshape(B, C, gh, ph, gw, pw)
    patches = patches.transpose(0, 2, 4, 1, 3, 5)
    patches = patches.reshape(B * num_patches, C * ph * pw)
    M, K = patches.shape

    # --- cast matmul operands to bf16; keep f32 accumulation in-kernel ---
    patches = patches.astype(compute_dtype)
    w_mat = weight.reshape(E, K).T.astype(compute_dtype)     # (K, E)
    b_vec = bias.astype(jnp.float32)

    # --- lane-dense output: pad E up to a multiple of 128 ---
    E_pad = _round_up(E, 128)
    if E_pad != E:
        w_mat = jnp.pad(w_mat, ((0, 0), (0, E_pad - E)))
        b_vec = jnp.pad(b_vec, ((0, E_pad - E),))
    b_mat = b_vec.reshape(1, E_pad)

    # --- tile M: TM multiple of 8 (sublane), pad M up to a TM multiple ---
    TM = _round_up(min(block_m, _round_up(M, 8)), 8)
    M_pad = _round_up(M, TM)
    if M_pad != M:
        patches = jnp.pad(patches, ((0, M_pad - M), (0, 0)))

    # --- explicit VMEM budget: resident weight/bias + double-buffered tiles ---
    in_bytes = jnp.dtype(compute_dtype).itemsize
    out_bytes = jnp.dtype(out_dtype).itemsize
    vmem_bytes = (K * E_pad * in_bytes            # resident weight
                  + E_pad * 4                     # resident bias (f32)
                  + 2 * TM * K * in_bytes         # double-buffered patch tile
                  + 2 * TM * E_pad * out_bytes)   # double-buffered output tile
    vmem_bytes = int(min(max(vmem_bytes + (4 << 20), 16 << 20), 48 << 20))

    grid = (M_pad // TM,)

    out = pl.pallas_call(
        _patch_embed_kernel,
        out_shape=jax.ShapeDtypeStruct((M_pad, E_pad), out_dtype),
        grid_spec=pltpu.PrefetchScalarGridSpec(
            num_scalar_prefetch=0,
            grid=grid,
            in_specs=[
                pl.BlockSpec((TM, K), lambda i: (i, 0)),      # streamed patches
                pl.BlockSpec((K, E_pad), lambda i: (0, 0)),   # resident weight
                pl.BlockSpec((1, E_pad), lambda i: (0, 0)),   # resident bias
            ],
            out_specs=pl.BlockSpec((TM, E_pad), lambda i: (i, 0)),
        ),
        compiler_params=pltpu.CompilerParams(
            dimension_semantics=("parallel",),
            vmem_limit_bytes=vmem_bytes,
        ),
    )(patches, w_mat, b_mat)

    # Drop padding, then flatten(2).transpose(1, 2) equivalent: (B*N, E) -> (B, N, E)
    out = out[:M, :E]
    return out.reshape(B, num_patches, E)


if __name__ == "__main__":
    # Small shapes consistent with the module: B=2, C=4, H=W=16, patch=4, E=32
    B, C, H, W = 2, 4, 16, 16
    patch = (4, 4)
    embed_dim = 32

    key = jax.random.PRNGKey(0)
    kx, kw, kb = jax.random.split(key, 3)

    x = jax.random.normal(kx, (B, C, H, W), dtype=jnp.float32)
    # Deterministic parameter init (Conv2d weight/bias shapes).
    weight = jax.random.normal(kw, (embed_dim, C, patch[0], patch[1]),
                               dtype=jnp.float32) * 0.02
    bias = jax.random.normal(kb, (embed_dim,), dtype=jnp.float32) * 0.02

    fn = jax.jit(functools.partial(patch_embed, patch_size=patch))
    out = jax.block_until_ready(fn(x, weight, bias))

    # Reference with the same bf16 operand precision (f32 accumulation), same
    # semantics as nn.Conv2d(stride=kernel) + flatten(2).transpose(1, 2).
    ref = jax.lax.conv_general_dilated(
        x.astype(jnp.bfloat16), weight.astype(jnp.bfloat16),
        window_strides=patch, padding="VALID",
        dimension_numbers=("NCHW", "OIHW", "NCHW"),
        preferred_element_type=jnp.float32,
    ) + bias[None, :, None, None]
    ref = ref.reshape(B, embed_dim, -1).transpose(0, 2, 1).astype(out.dtype)

    assert out.shape == (B, (H // patch[0]) * (W // patch[1]), embed_dim)
    assert jnp.allclose(out, ref, atol=2e-3, rtol=2e-3)
    print("KERNEL_OK")
</pallas_src>

<mosaic_0001>
module attributes {stable_mosaic.version = 11 : i64} {
  func.func @_patch_embed_kernel(%arg0: i32, %arg1: memref<32x64xbf16, #tpu.memory_space<vmem>>, %arg2: memref<64x128xbf16, #tpu.memory_space<vmem>>, %arg3: memref<1x128xf32, #tpu.memory_space<vmem>>, %arg4: memref<32x128xf32, #tpu.memory_space<vmem>>) attributes {dimension_semantics = [#tpu.dimension_semantics<parallel>], iteration_bounds = array<i64: 1>, scalar_prefetch = 0 : i64, scratch_operands = 0 : i64, tpu.core_type = #tpu.core_type<tc>, window_params = [{transform_indices = @transform_0, window_bounds = array<i64: 32, 64>}, {pipeline_mode = #tpu.pipeline_mode<synchronous>, transform_indices = @transform_1, window_bounds = array<i64: 64, 128>}, {pipeline_mode = #tpu.pipeline_mode<synchronous>, transform_indices = @transform_2, window_bounds = array<i64: 1, 128>}, {transform_indices = @transform_3, window_bounds = array<i64: 32, 128>}]} {
    %c0 = arith.constant 0 : index
    %c0_0 = arith.constant 0 : index
    %0 = vector.load %arg1[%c0, %c0_0] : memref<32x64xbf16, #tpu.memory_space<vmem>>, vector<32x64xbf16>
    %c0_1 = arith.constant 0 : index
    %c0_2 = arith.constant 0 : index
    %1 = vector.load %arg2[%c0_1, %c0_2] : memref<64x128xbf16, #tpu.memory_space<vmem>>, vector<64x128xbf16>
    %cst = arith.constant dense<0.000000e+00> : vector<32x128xf32>
    %2 = tpu.matmul %0, %1, %cst {dimension_numbers = #tpu.dot_dimension_numbers<[1], [0], [0], [1], [0, 0, 1, 1], [], []>} : vector<32x64xbf16>, vector<64x128xbf16>, vector<32x128xf32> -> vector<32x128xf32>
    %c0_3 = arith.constant 0 : index
    %c0_4 = arith.constant 0 : index
    %3 = vector.load %arg3[%c0_3, %c0_4] : memref<1x128xf32, #tpu.memory_space<vmem>>, vector<1x128xf32>
    %4 = vector.broadcast %3 : vector<1x128xf32> to vector<32x128xf32>
    %5 = arith.addf %2, %4 : vector<32x128xf32>
    %c0_5 = arith.constant 0 : index
    %c0_6 = arith.constant 0 : index
    %6 = vector.load %arg4[%c0_5, %c0_6] : memref<32x128xf32, #tpu.memory_space<vmem>>, vector<32x128xf32>
    tpu.vector_store %arg4[%c0_5, %c0_6], %5 {strides = array<i32>} : memref<32x128xf32, #tpu.memory_space<vmem>>, vector<32x128xf32>,
    return
  }
  func.func @transform_0(%arg0: i32) -> (i32, i32) {
    %c0_i32 = arith.constant 0 : i32
    %c0_i32_0 = arith.constant 0 : i32
    return %arg0, %c0_i32 : i32, i32
  }
  func.func @transform_1(%arg0: i32) -> (i32, i32) {
    %c0_i32 = arith.constant 0 : i32
    %c0_i32_0 = arith.constant 0 : i32
    %c0_i32_1 = arith.constant 0 : i32
    return %c0_i32, %c0_i32_0 : i32, i32
  }
  func.func @transform_2(%arg0: i32) -> (i32, i32) {
    %c0_i32 = arith.constant 0 : i32
    %c0_i32_0 = arith.constant 0 : i32
    %c0_i32_1 = arith.constant 0 : i32
    return %c0_i32, %c0_i32_0 : i32, i32
  }
  func.func @transform_3(%arg0: i32) -> (i32, i32) {
    %c0_i32 = arith.constant 0 : i32
    %c0_i32_0 = arith.constant 0 : i32
    return %arg0, %c0_i32 : i32, i32
  }
}

</mosaic_0001>

<bundles_post_ra>
// kernel: patch_embed.1
= control target key start
LH: loop header
LB: loop body
LE: loop exit
PB: predicated region body
PF: predicated region fallthrough
CT: control target
= control target key end

     0   :  { %s227_s0 = inlined_call_operand.vmem [shape: bf16[32,64], index: 0, kind: input, shape index: {}]   ;;  %s228_s1 = inlined_call_operand.vmem [shape: bf16[64,128], index: 1, kind: input, shape index: {}]   ;;  %s229_s2 = inlined_call_operand.vmem [shape: f32[1,128], index: 2, kind: input, shape index: {}]   ;;  %s230_s3 = inlined_call_operand.hbm [shape: f32[32,128], index: 3, kind: output, shape index: {}]  }
   0x1   :  { %v145_v0 = vld [vmem:[%s228_s1 + $0x18] sm:$0xff]  ;;  %v144_v1 = vld [vmem:[%s228_s1 + $0x10] sm:$0xff] }
   0x2   :  { %77 = vmatpush.bf16.msra.mxu0 %v145_v0  ;;  %146 = vmatpush.bf16.msra.mxu1 %v145_v0 }
   0x3   :  { %8 = vsyncpa [#allocation3], 0  ;;  %v143_v2 = vld [vmem:[%s228_s1 + $0x8] sm:$0xff]  ;;  %v142_v3 = vld [vmem:[%s228_s1] sm:$0xff]  ;;  %vm66_vm0 = vcmask 523264   ;;  %s180_s1 = smov [#allocation2]  }
   0x4   :  { %v140_v4 = vld [vmem:[%s227_s0] sm:$0xff]  ;;  %v141_v5 = vld [vmem:[%s227_s0 + $0x8] sm:$0xff]  ;;  %s100_s26 = sshll.u32 %s180_s1, 4  ;;  %s102_s0 = sshll.u32 %s230_s3, 4  ;;  %s101_s26 = int_to_ptr.vmem [resolvable:$true] %s100_s26  ;;  %s103_s0 = int_to_ptr.hbm [resolvable:$true] %s102_s0 }
   0x5   :  { %v153_v6 = vld [vmem:[%s229_s2] ss:$0 sm:$0xff]  ;;  %s181_s2 = smov 128   ;;  %s182_s29 = smov 8  }
   0x6   :  { %78 = vmatpush.bf16.msra.mxu0 %v144_v1  ;;  %147 = vmatpush.bf16.msra.mxu1 %v144_v1 }
   0xa   :  { %79 = vmatpush.bf16.msra.mxu0 %v143_v2  ;;  %148 = vmatpush.bf16.msra.mxu1 %v143_v2 }
   0xe   :  { %80 = vmatpush.bf16.msra.mxu0 %v142_v3  ;;  %149 = vmatpush.bf16.msra.mxu1 %v142_v3 }
  0x11   :  { %138 = vmatmul.msk.bf16.vlgmr.msra.gmra.mxu0 %vm66_vm0, %v140_v4  ;;  %139 = vmatmul.msk.bf16.vlgmr.msra.gmra.mxu1 %vm66_vm0, %v141_v5 }
  0x8e   :  { %v82_v7 = vpop.f32.mrf.mxu0  ;;  %v87_v8 = vpop.f32.mrf.mxu1 }
  0x8f   :  { %v83_v9 = vadd.f32 %v153_v6, %v82_v7  ;;  %v88_v10 = vadd.f32 %v153_v6, %v87_v8 }
  0x91   :  { %92 = vst [vmem:[#allocation2] sm:$0xff] %v83_v9 }
  0x92   :  { %94 = vst [vmem:[#allocation2 + $0x10] sm:$0xff] %v88_v10 }
  0x96   :  { %v84_v11 = vpop.f32.mrf.mxu0  ;;  %v89_v12 = vpop.f32.mrf.mxu1 }
  0x97   :  { %v85_v13 = vadd.f32 %v153_v6, %v84_v11  ;;  %v90_v14 = vadd.f32 %v153_v6, %v89_v12 }
  0x99   :  { %93 = vst [vmem:[#allocation2 + $0x8] sm:$0xff] %v85_v13 }
  0x9a   :  { %95 = vst [vmem:[#allocation2 + $0x18] sm:$0xff] %v90_v14 }
  0x9b   :  { %108 = dma.vmem_to_hbm [thread:$0]  %s101_s26, 512, %s103_s0, [#allocation3], %s181_s2, %s181_s2, %s182_s29  }
  0x9c   :  { %178 = dma.done.wait [#allocation3], 512  }
  0x9d   :  { %179 = vsyncadd [#allocation3], 4294966784 }
  0x9e   :  { %113 = vsyncpa [#allocation3], 1 }

</bundles_post_ra>
